<compile_context>
chip_gen: v7x
topology: tpu7x:2x2x1
jax: 0.10.0
libtpu: 0.0.40
codegen_flags: <defaults>
</compile_context>

<pallas_src>
import functools

import jax
import jax.numpy as jnp
import numpy as np
from jax import lax
from jax.experimental import pallas as pl
from jax.experimental.pallas import tpu as pltpu


def _lambda_shortcut_kernel(x_ref, s_ref, o_ref):
    # x_ref: (TB, C, H*W)            batch chunk, spatial flattened (lane-dense)
    # s_ref: (H*W, H_out*W_out)      0/1 stride-2 selection matrix (VMEM resident)
    # o_ref: (TB, C_out, H_out*W_out)
    TB, C, HW = x_ref.shape
    _, C_out, HWo = o_ref.shape
    pad_lo = (C_out - C) // 2
    pad_hi = C_out - C - pad_lo

    # One MXU matmul over the flattened spatial dim performs the stride-2
    # subsample; K = H*W (hundreds wide) so the MXU runs near full tiles and the
    # result is already in the lane-dense flat layout needed for the store.
    # Leading-dim merge/split reshapes are free relabels when C % 8 == 0
    # (C = 16, 32 for every shortcut in this ResNet).
    x2 = x_ref[...].reshape(TB * C, HW)
    y2 = lax.dot_general(
        x2, s_ref[...],
        dimension_numbers=(((1,), (0,)), ((), ())),
        precision=lax.Precision.HIGHEST,        # exact 0/1 copy of f32 mantissa
        preferred_element_type=jnp.float32)     # (TB*C, HWo)
    y = y2.reshape(TB, C, HWo).astype(o_ref.dtype)

    # Direct sub-block stores (no concatenate, no second full-block temporary).
    # pad_lo / pad_hi are multiples of 8 here -> sublane-aligned, unmasked.
    if pad_lo:
        o_ref[:, :pad_lo, :] = jnp.zeros((TB, pad_lo, HWo), o_ref.dtype)
    o_ref[:, pad_lo:pad_lo + C, :] = y
    if pad_hi:
        o_ref[:, pad_lo + C:, :] = jnp.zeros((TB, pad_hi, HWo), o_ref.dtype)


@functools.lru_cache(maxsize=None)
def _selection_matrix(H, W, H_out, W_out, dtype_name):
    """(H*W, H_out*W_out) 0/1 matrix: S[h*W+w, ho*W_out+wo] = (h==2ho) & (w==2wo)."""
    hw = np.arange(H * W)
    h, w = hw // W, hw % W
    ohw = np.arange(H_out * W_out)
    oh, ow = ohw // W_out, ohw % W_out
    sel = (h[:, None] == 2 * oh[None, :]) & (w[:, None] == 2 * ow[None, :])
    return jnp.asarray(sel.astype(np.dtype(dtype_name)))


def _vmem_capacity_bytes():
    try:
        return int(pltpu.get_tpu_info().vmem_capacity_bytes)
    except Exception:
        return 64 * 1024 * 1024          # conservative: v7x per-TensorCore VMEM


def _pad_lane(n):
    return -(-n // 128) * 128


def _pad_sub(n):
    return -(-n // 8) * 8


def lambda_shortcut(x, planes, *, vmem_budget_bytes=None, min_grid_steps=4):
    """Pallas version of the option-A shortcut lambda (NCHW input)."""
    N, C, H, W = x.shape
    H_out = -(-H // 2)                   # ceil(H/2), matches x[:, :, ::2, ::2]
    W_out = -(-W // 2)
    pad = planes // 4
    C_out = C + 2 * pad                  # symmetric pad -> C_out - C is even
    dtype = x.dtype
    itemsize = jnp.dtype(dtype).itemsize
    HW, HWo = H * W, H_out * W_out

    S = _selection_matrix(H, W, H_out, W_out, jnp.dtype(dtype).name)

    # Free metadata reshape: flatten spatial dims so loads see H*W lanes and
    # stores see H_out*W_out lanes (lane-dense on both sides).
    x3 = x.reshape(N, C, HW)

    # --- Generation-aware VMEM budgeting -------------------------------------
    cap = _vmem_capacity_bytes()
    if vmem_budget_bytes is None:
        # ~3/8 of physical VMEM: ~48 MiB on v5e/v6e (128 MiB), ~24 MiB on v7x (64 MiB).
        vmem_budget_bytes = (3 * cap) // 8

    # Per-sample footprint with (8,128)-tile padding: double-buffered input and
    # output blocks plus the f32 matmul result; the selection matrix is a fixed
    # (double-buffered) cost.
    per_in = _pad_sub(C) * _pad_lane(HW) * itemsize
    per_out = _pad_sub(C_out) * _pad_lane(HWo) * itemsize
    per_tmp = _pad_sub(C) * _pad_lane(HWo) * 4
    per_sample = 2 * per_in + 2 * per_out + per_tmp
    fixed = 2 * _pad_sub(HW) * _pad_lane(HWo) * itemsize

    tb = max(1, (vmem_budget_bytes - fixed) // per_sample)
    # Keep >= min_grid_steps grid steps so DMA/compute overlap and both v7x
    # TensorCores get work; ~0.35 us/step overhead is negligible at these sizes.
    tb = int(min(tb, max(1, (N + min_grid_steps - 1) // min_grid_steps), N))
    grid = (pl.cdiv(N, tb),)             # trailing partial block: harmless rewrite

    vmem_limit = int(min(3 * cap // 4,
                         max(32 * 1024 * 1024,
                             fixed + tb * per_sample + (tb * per_sample) // 2
                             + (8 << 20))))

    cost = pl.CostEstimate(
        flops=2 * N * C * HW * HWo,
        transcendentals=0,
        bytes_accessed=(N * C * HW + N * C_out * HWo + HW * HWo) * itemsize)

    out_flat = pl.pallas_call(
        _lambda_shortcut_kernel,
        out_shape=jax.ShapeDtypeStruct((N, C_out, HWo), dtype),
        grid_spec=pltpu.PrefetchScalarGridSpec(
            num_scalar_prefetch=0,
            grid=grid,
            in_specs=[
                pl.BlockSpec((tb, C, HW), lambda b: (b, 0, 0)),
                # Constant index_map: stays VMEM-resident across the grid.
                pl.BlockSpec((HW, HWo), lambda b: (0, 0)),
            ],
            out_specs=pl.BlockSpec((tb, C_out, HWo), lambda b: (b, 0, 0)),
        ),
        compiler_params=pltpu.CompilerParams(
            # Batch chunks are independent -> megacore-shardable on v7x.
            dimension_semantics=("parallel",),
            vmem_limit_bytes=vmem_limit),
        cost_estimate=cost,
    )(x3, S)

    return out_flat.reshape(N, C_out, H_out, W_out)


if __name__ == "__main__":
    key = jax.random.PRNGKey(0)
    # Shapes matching the first downsampling shortcut of the 1w4a ResNet
    # (16 -> 32 channels), kept small: batch=2, C=16, spatial 16x16.
    N, C, H, W = 2, 16, 16, 16
    planes = 32                          # pad = planes // 4 = 8 channels per side

    x = jax.random.normal(key, (N, C, H, W), dtype=jnp.float32)

    out = jax.block_until_ready(lambda_shortcut(x, planes))

    # Pure-JAX reference of the PyTorch lambda:
    #   F.pad(x[:, :, ::2, ::2], (0, 0, 0, 0, planes//4, planes//4), "constant", 0)
    ref = jnp.pad(x[:, :, ::2, ::2],
                  ((0, 0), (planes // 4, planes // 4), (0, 0), (0, 0)))

    assert out.shape == ref.shape, (out.shape, ref.shape)
    assert out.dtype == ref.dtype, (out.dtype, ref.dtype)
    assert jnp.allclose(out, ref, atol=1e-5, rtol=1e-5)
    print("KERNEL_OK")
</pallas_src>

<mosaic_0001>
module attributes {stable_mosaic.version = 11 : i64} {
  func.func @_lambda_shortcut_kernel(%arg0: i32, %arg1: memref<1x16x256xf32, #tpu.memory_space<vmem>>, %arg2: memref<256x64xf32, #tpu.memory_space<vmem>>, %arg3: memref<1x32x64xf32, #tpu.memory_space<vmem>>) attributes {dimension_semantics = [#tpu.dimension_semantics<parallel>], iteration_bounds = array<i64: 2>, scalar_prefetch = 0 : i64, scratch_operands = 0 : i64, tpu.core_type = #tpu.core_type<tc>, window_params = [{transform_indices = @transform_0, window_bounds = array<i64: 1, 16, 256>}, {pipeline_mode = #tpu.pipeline_mode<synchronous>, transform_indices = @transform_1, window_bounds = array<i64: 256, 64>}, {transform_indices = @transform_2, window_bounds = array<i64: 1, 32, 64>}]} {
    %c0 = arith.constant 0 : index
    %c0_0 = arith.constant 0 : index
    %c0_1 = arith.constant 0 : index
    %0 = vector.load %arg1[%c0, %c0_0, %c0_1] : memref<1x16x256xf32, #tpu.memory_space<vmem>>, vector<1x16x256xf32>
    %1 = vector.shape_cast %0 : vector<1x16x256xf32> to vector<16x256xf32>
    %c0_2 = arith.constant 0 : index
    %c0_3 = arith.constant 0 : index
    %2 = vector.load %arg2[%c0_2, %c0_3] : memref<256x64xf32, #tpu.memory_space<vmem>>, vector<256x64xf32>
    %cst = arith.constant dense<0.000000e+00> : vector<16x64xf32>
    %3 = tpu.matmul %1, %2, %cst {dimension_numbers = #tpu.dot_dimension_numbers<[1], [0], [0], [1], [0, 0, 1, 1], [], []>, precision = #tpu.contract_precision<fp32>} : vector<16x256xf32>, vector<256x64xf32>, vector<16x64xf32> -> vector<16x64xf32>
    %4 = vector.shape_cast %3 : vector<16x64xf32> to vector<1x16x64xf32>
    %cst_4 = arith.constant 0.000000e+00 : f32
    %5 = vector.broadcast %cst_4 : f32 to vector<1x8x64xf32>
    %c0_5 = arith.constant 0 : index
    %c0_6 = arith.constant 0 : index
    %c0_7 = arith.constant 0 : index
    %6 = vector.load %arg3[%c0_5, %c0_6, %c0_7] : memref<1x32x64xf32, #tpu.memory_space<vmem>>, vector<1x8x64xf32>
    tpu.vector_store %arg3[%c0_5, %c0_6, %c0_7], %5 {strides = array<i32>} : memref<1x32x64xf32, #tpu.memory_space<vmem>>, vector<1x8x64xf32>,
    %c0_8 = arith.constant 0 : index
    %c8 = arith.constant 8 : index
    %c0_9 = arith.constant 0 : index
    %7 = vector.load %arg3[%c0_8, %c8, %c0_9] : memref<1x32x64xf32, #tpu.memory_space<vmem>>, vector<1x16x64xf32>
    tpu.vector_store %arg3[%c0_8, %c8, %c0_9], %4 {strides = array<i32>} : memref<1x32x64xf32, #tpu.memory_space<vmem>>, vector<1x16x64xf32>,
    %cst_10 = arith.constant 0.000000e+00 : f32
    %8 = vector.broadcast %cst_10 : f32 to vector<1x8x64xf32>
    %c0_11 = arith.constant 0 : index
    %c24 = arith.constant 24 : index
    %c0_12 = arith.constant 0 : index
    %9 = vector.load %arg3[%c0_11, %c24, %c0_12] : memref<1x32x64xf32, #tpu.memory_space<vmem>>, vector<1x8x64xf32>
    tpu.vector_store %arg3[%c0_11, %c24, %c0_12], %8 {strides = array<i32>} : memref<1x32x64xf32, #tpu.memory_space<vmem>>, vector<1x8x64xf32>,
    return
  }
  func.func @transform_0(%arg0: i32) -> (i32, i32, i32) {
    %c0_i32 = arith.constant 0 : i32
    %c0_i32_0 = arith.constant 0 : i32
    %c0_i32_1 = arith.constant 0 : i32
    return %arg0, %c0_i32, %c0_i32_0 : i32, i32, i32
  }
  func.func @transform_1(%arg0: i32) -> (i32, i32) {
    %c0_i32 = arith.constant 0 : i32
    %c0_i32_0 = arith.constant 0 : i32
    %c0_i32_1 = arith.constant 0 : i32
    return %c0_i32, %c0_i32_0 : i32, i32
  }
  func.func @transform_2(%arg0: i32) -> (i32, i32, i32) {
    %c0_i32 = arith.constant 0 : i32
    %c0_i32_0 = arith.constant 0 : i32
    %c0_i32_1 = arith.constant 0 : i32
    return %arg0, %c0_i32, %c0_i32_0 : i32, i32, i32
  }
}

</mosaic_0001>

<bundles_post_ra>
// kernel: tpu_custom_call.1
= control target key start
LH: loop header
LB: loop body
LE: loop exit
PB: predicated region body
PF: predicated region fallthrough
CT: control target
= control target key end

     0   :  { %7 = vsyncpa [#allocation3], 0  ;;  %s2401_s0 = inlined_call_operand.vmem [shape: f32[2,16,256], index: 0, kind: input, shape index: {}]   ;;  %s2402_s1 = inlined_call_operand.vmem [shape: f32[256,64], index: 1, kind: input, shape index: {}]   ;;  %s2403_s2 = inlined_call_operand.hbm [shape: f32[2,32,64], index: 2, kind: output, shape index: {}]  }
   0x1   :  { %9 = vsyncpa [#allocation3 + $0x1], 0  ;;  %s1736_s9 = smov 0   ;;  %s1738_s10 = smov 0  }
   0x2   :  { %s1740_s11 = smov 0   ;;  %s1742_s12 = smov 0  }
   0x3 LB: > { %s1757_s13 = sadd.s32 4294967295, %s1715_s12   ;;  %s1177_s14 = sadd.s32 4294967294, %s1715_s12   ;;  %s1715_s12 = sphi %s1742_s12, %s2509_s12   ;;  %s1711_s11 = sphi %s1740_s11, %s2508_s11   ;;  %s1707_s10 = sphi %s1738_s10, %s2507_s10   ;;  %s1703_s9 = sphi %s1736_s9, %s2506_s9  }
   0x4   : > { %s1761_s15 = sadd.s32 1, %s1715_s12   ;;  %s69_s16 = sadd.s32 1, %s1711_s11 }
   0x5   : > { %s66_s17 = ssub.s32 %s1715_s12, %s1761_s15  ;;  %p79_p0 = scmp.ne.s32.totalorder %s1711_s11, %s1707_s10 }
   0x6   : > { %p67_p1 = scmp.eq.s32.totalorder %s66_s17, 0  ;;  %p80_p2 = scmp.eq.s32.totalorder %s1757_s13, 1 }
   0x7   : > { %p85_p3 = scmp.ne.s32.totalorder %s1707_s10, %s1703_s9  ;;  %p86_p4 = scmp.eq.s32.totalorder %s1177_s14, 1 }
   0x8   : > { %s1772_s18 = scalar_select %p67_p1, %s1711_s11, %s69_s16  }
   0x9   : > { %p1774_p5 = por %p80_p2, %p79_p0  ;;  %p1778_p6 = por %p86_p4, %p85_p3 }
   0xa   : > { %p1180_p7 = scmp.ge.s32.totalorder %s1715_s12, 1  ;;  %p115_p8 = scmp.lt.s32.totalorder %s1715_s12, 3 }
   0xc   : > { %p116_p9 = pnand %p1180_p7, %p115_p8 }
   0xe   : > { %119 = sbr.rel (%p116_p9) target bundleno = 382 (0x17e), region = 28 }
  0x15   : > { %v162_v0 = vld [vmem:[%s2402_s1 + $0x80] sm:$0xff]  ;;  %v163_v1 = vld [vmem:[%s2402_s1 + $0x88] sm:$0xff]  ;;  %v164_v7 = vld [vmem:[%s2402_s1 + $0x90] sm:$0xff]  ;;  %p137_p10 = scmp.lt.s32.totalorder %s1757_s13, 1  ;;  %s134_s5 = sand.u32 1, %s1707_s10   ;;  %vm1096_vm0 = vcmask 523264  }
  0x16   : > { %v146_v2 = vld [vmem:[%s2402_s1] sm:$0xff]  ;;  %v227_v3 = vand.u32 4294901760, %v162_v0  ;;  %v230_v4 = vand.u32 4294901760, %v163_v1  ;;  %v147_v5 = vld [vmem:[%s2402_s1 + $0x8] sm:$0xff]  ;;  %v165_v8 = vld [vmem:[%s2402_s1 + $0x98] sm:$0xff]  ;;  %v233_v10 = vand.u32 4294901760, %v164_v7 }
  0x17   : > { %v179_v6 = vand.u32 4294901760, %v146_v2  ;;  %v182_v9 = vand.u32 4294901760, %v147_v5  ;;  %v236_v11 = vand.u32 4294901760, %v165_v8  ;;  %v148_v12 = vld [vmem:[%s2402_s1 + $0x10] sm:$0xff]  ;;  %v149_v13 = vld [vmem:[%s2402_s1 + $0x18] sm:$0xff]  ;;  %v166_v18 = vld [vmem:[%s2402_s1 + $0xa0] sm:$0xff] }
  0x18   : > { %v1808_v14 = vpack.c.bf16 %v230_v4, %v227_v3  ;;  %v185_v16 = vand.u32 4294901760, %v148_v12  ;;  %v188_v17 = vand.u32 4294901760, %v149_v13  ;;  %v167_v19 = vld [vmem:[%s2402_s1 + $0xa8] sm:$0xff]  ;;  %v150_v23 = vld [vmem:[%s2402_s1 + $0x20] sm:$0xff]  ;;  %v1831_v25 = vsub.f32 %v164_v7, %v233_v10  ;;  %v168_v37 = vld [vmem:[%s2402_s1 + $0xb0] sm:$0xff]  ;;  %s2008_s14 = scalar_select %p137_p10, %s1757_s13, 1 }
  0x19   : > { %v1810_v15 = vsub.f32 %v146_v2, %v179_v6  ;;  %v1818_v20 = vpack.c.bf16 %v182_v9, %v179_v6  ;;  %v1820_v21 = vsub.f32 %v147_v5, %v182_v9  ;;  %v1822_v22 = vpack.c.bf16 %v236_v11, %v233_v10  ;;  %v151_v24 = vld [vmem:[%s2402_s1 + $0x28] sm:$0xff]  ;;  %v169_v42 = vld [vmem:[%s2402_s1 + $0xb8] sm:$0xff]  ;;  %v152_v55 = vld [vmem:[%s2402_s1 + $0x30] sm:$0xff]  ;;  %s1181_s6 = sshll.u32 %s134_s5, 5  ;;  %s2360_s22 = scalar_lea.sflag [#allocation3], %s134_s5 }
  0x1a   : > { %1420 = vmatprep.subr.bf16.mxu0 %v1808_v14  ;;  %v1833_v26 = vsub.f32 %v165_v8, %v236_v11  ;;  %v1835_v27 = vpack.c.bf16 %v188_v17, %v185_v16  ;;  %v1837_v28 = vsub.f32 %v148_v12, %v185_v16  ;;  %v239_v29 = vand.u32 4294901760, %v166_v18  ;;  %v153_v56 = vld [vmem:[%s2402_s1 + $0x38] sm:$0xff]  ;;  %v170_v5 = vld [vmem:[%s2402_s1 + $0xc0] sm:$0xff]  ;;  %v171_v6 = vld [vmem:[%s2402_s1 + $0xc8] sm:$0xff]  ;;  %s1189_s25 = sshll.u32 %s2008_s14, 5  ;;  %s2339_s7 = scalar_lea.vmem [#allocation2], %s1181_s6 }
  0x1b   : > { %1422 = vmatpush3.bf16.msra.mxu0 %v1818_v20  ;;  %v242_v30 = vand.u32 4294901760, %v167_v19  ;;  %v1840_v31 = vsub.f32 %v162_v0, %v227_v3  ;;  %v1842_v32 = vsub.f32 %v163_v1, %v230_v4  ;;  %v191_v33 = vand.u32 4294901760, %v150_v23  ;;  %v154_v11 = vld [vmem:[%s2402_s1 + $0x40] sm:$0xff]  ;;  %s2065_s4 = scalar_lea.vmem %s2401_s0, %s1189_s25  ;;  %s1115_s8 = sshll.u32 %s2339_s7, 4  ;;  %s2354_s8 = int_to_ptr.vmem [resolvable:$true] %s1115_s8 }
  0x1c   : > { %1424 = vmatprep.subr.bf16.mxu0 %v1822_v22  ;;  %v194_v34 = vand.u32 4294901760, %v151_v24  ;;  %v2421_v35 = vand.u32 4294901760, %v1810_v15  ;;  %v2420_v36 = vand.u32 4294901760, %v1820_v21  ;;  %v1850_v38 = vsub.f32 %v149_v13, %v188_v17  ;;  %s1190_s14 = sshll.u32 %s1757_s13, 9  ;;  %s1653_s13 = scalar_lea.vmem %s2354_s8, 512 }
  0x1d   : > { %v1852_v39 = vpack.c.bf16 %v242_v30, %v239_v29  ;;  %v1854_v40 = vsub.f32 %v166_v18, %v239_v29  ;;  %v2423_v41 = vand.u32 4294901760, %v1840_v31  ;;  %v1860_v43 = vsub.f32 %v167_v19, %v242_v30  ;;  %v155_v29 = vld [vmem:[%s2402_s1 + $0x48] sm:$0xff]  ;;  %s2352_s21 = scalar_lea.hbm %s2403_s2, %s1190_s14  ;;  %p1654_p11 = scmp.ne.s32.totalorder %s2354_s8, %s1653_s13 }
  0x1e   : > { %v2422_v44 = vand.u32 4294901760, %v1842_v32  ;;  %v1863_v45 = vpack.c.bf16 %v194_v34, %v191_v33  ;;  %v1865_v46 = vsub.f32 %v150_v23, %v191_v33  ;;  %v309_v48 = vsub.f32 %v1810_v15, %v2421_v35  ;;  %s1718_s23 = smov [#allocation2]  }
  0x1f   : > { %1426 = vmatpush3.bf16.msra.mxu0 %v1835_v27  ;;  %v421_v47 = vsub.f32 %v1840_v31, %v2423_v41  ;;  %v316_v49 = vsub.f32 %v1820_v21, %v2420_v36  ;;  %v245_v50 = vand.u32 4294901760, %v168_v37  ;;  %v248_v52 = vand.u32 4294901760, %v169_v42  ;;  %v143_v41 = vld [vmem:[%s2065_s4 + $0x8] sm:$0xff]  ;;  %p1655_p12 = pnand %p1654_p11, %p1774_p5  ;;  %s1657_s24 = sshll.u32 %s1718_s23, 4  ;;  %s1658_s24 = int_to_ptr.vmem [resolvable:$false] %s1657_s24 }
  0x20   : > { %1428 = vmatprep.subr.bf16.mxu0 %v1852_v39  ;;  %v428_v51 = vsub.f32 %v1842_v32, %v2422_v44  ;;  %v2419_v53 = vand.u32 4294901760, %v1831_v25  ;;  %v2416_v54 = vand.u32 4294901760, %v1833_v26  ;;  %v1889_v58 = vsub.f32 %v151_v24, %v194_v34  ;;  %s1659_s25 = scalar_lea.vmem %s1658_s24, 1024  ;;  %p1660_p0 = scmp.lt.s32.totalorder %s2354_s8, %s1658_s24 }
  0x21   : > { %v422_v57 = vand.u32 4294901760, %v421_v47  ;;  %v310_v59 = vand.u32 4294901760, %v309_v48  ;;  %v317_v60 = vand.u32 4294901760, %v316_v49  ;;  %v1891_v62 = vpack.c.bf16 %v248_v52, %v245_v50  ;;  %p1656_p13 = pneg %p1655_p12  ;;  %p1661_p1 = scmp.lt.s32.totalorder %s1659_s25, %s1653_s13 }
  0x22   : > { %v429_v61 = vand.u32 4294901760, %v428_v51  ;;  %v1893_v63 = vsub.f32 %v168_v37, %v245_v50  ;;  %v435_v0 = vsub.f32 %v1831_v25, %v2419_v53  ;;  %v442_v2 = vsub.f32 %v1833_v26, %v2416_v54 }
  0x23   : > { %1430 = vmatpush3.bf16.msra.mxu0 %v1863_v45  ;;  %v1453_v1 = vpack.c.bf16 %v317_v60, %v310_v59  ;;  %v197_v3 = vand.u32 4294901760, %v152_v55  ;;  %v200_v4 = vand.u32 4294901760, %v153_v56  ;;  %v2415_v9 = vand.u32 4294901760, %v1837_v28  ;;  %p1662_p2 = por %p1661_p1, %p1660_p0 }
  0x24   : > { %v1451_v7 = vpack.c.bf16 %v429_v61, %v422_v57  ;;  %1432 = vmatprep.subr.bf16.mxu0 %v1891_v62  ;;  %v436_v8 = vand.u32 4294901760, %v435_v0  ;;  %v2412_v10 = vand.u32 4294901760, %v1850_v38  ;;  %v1914_v12 = vsub.f32 %v169_v42, %v248_v52  ;;  %v173_v57 = vld [vmem:[%s2402_s1 + $0xd8] sm:$0xff] }
  0x25   : > { %v443_v13 = vand.u32 4294901760, %v442_v2  ;;  %v1916_v16 = vpack.c.bf16 %v200_v4, %v197_v3  ;;  %v1918_v17 = vsub.f32 %v152_v55, %v197_v3  ;;  %v323_v18 = vsub.f32 %v1837_v28, %v2415_v9  ;;  %p1663_p3 = pnand %p1662_p2, %p1656_p13 }
  0x26   : > { %1452 = vmatprep.subr.bf16.mxu1 %v1451_v7  ;;  %v330_v19 = vsub.f32 %v1850_v38, %v2412_v10  ;;  %v251_v23 = vand.u32 4294901760, %v170_v5  ;;  %v254_v24 = vand.u32 4294901760, %v171_v6  ;;  %v2411_v33 = vand.u32 4294901760, %v1854_v40 }
  0x27   : > { %1454 = vmatpush3.bf16.msra.mxu1 %v1453_v1  ;;  %v1455_v30 = vpack.c.bf16 %v443_v13, %v436_v8  ;;  %1434 = vmatpush3.bf16.msra.mxu0 %v1916_v16  ;;  %v2409_v34 = vand.u32 4294901760, %v1860_v43  ;;  %v203_v37 = vand.u32 4294901760, %v154_v11  ;;  %v1932_v42 = vsub.f32 %v153_v56, %v200_v4  ;;  %v172_v56 = vld [vmem:[%s2402_s1 + $0xd0] sm:$0xff] }
  0x28   : > { %v324_v47 = vand.u32 4294901760, %v323_v18  ;;  %v331_v48 = vand.u32 4294901760, %v330_v19  ;;  %v1934_v49 = vpack.c.bf16 %v254_v24, %v251_v23  ;;  %v1936_v50 = vsub.f32 %v170_v5, %v251_v23  ;;  %v156_v1 = vld [vmem:[%s2402_s1 + $0x50] sm:$0xff]  ;;  %v157_v18 = vld [vmem:[%s2402_s1 + $0x58] sm:$0xff] }
  0x29   : > { %1456 = vmatprep.subr.bf16.mxu1 %v1455_v30  ;;  %v449_v51 = vsub.f32 %v1854_v40, %v2411_v33  ;;  %v456_v52 = vsub.f32 %v1860_v43, %v2409_v34  ;;  %v206_v55 = vand.u32 4294901760, %v155_v29  ;;  %v1951_v60 = vsub.f32 %v171_v6, %v254_v24 }
  0x2a   : > { %v1457_v59 = vpack.c.bf16 %v331_v48, %v324_v47  ;;  %1436 = vmatprep.subr.bf16.mxu0 %v1934_v49  ;;  %v2408_v61 = vand.u32 4294901760, %v1865_v46  ;;  %v2406_v0 = vand.u32 4294901760, %v1889_v58  ;;  %v1960_v5 = vsub.f32 %v154_v11, %v203_v37 }
  0x2b   : > { %v450_v2 = vand.u32 4294901760, %v449_v51  ;;  %v457_v3 = vand.u32 4294901760, %v456_v52  ;;  %v1958_v4 = vpack.c.bf16 %v206_v55, %v203_v37  ;;  %v257_v8 = vand.u32 4294901760, %v172_v56 }
  0x2c   : > { %1458 = vmatpush3.bf16.msra.mxu1 %v1457_v59  ;;  %v337_v6 = vsub.f32 %v1865_v46, %v2408_v61  ;;  %v344_v7 = vsub.f32 %v1889_v58, %v2406_v0  ;;  %v260_v13 = vand.u32 4294901760, %v173_v57  ;;  %v2405_v11 = vand.u32 4294901760, %v1893_v63 }
  0x2d   : > { %v1459_v19 = vpack.c.bf16 %v457_v3, %v450_v2  ;;  %1438 = vmatpush3.bf16.msra.mxu0 %v1958_v4  ;;  %v2404_v23 = vand.u32 4294901760, %v1914_v12  ;;  %v209_v24 = vand.u32 4294901760, %v156_v1  ;;  %v1975_v30 = vsub.f32 %v155_v29, %v206_v55  ;;  %v174_v29 = vld [vmem:[%s2402_s1 + $0xe0] sm:$0xff]  ;;  %v175_v55 = vld [vmem:[%s2402_s1 + $0xe8] sm:$0xff] }
  0x2e   : > { %v338_v37 = vand.u32 4294901760, %v337_v6  ;;  %v345_v47 = vand.u32 4294901760, %v344_v7  ;;  %v1977_v48 = vpack.c.bf16 %v260_v13, %v257_v8  ;;  %v1979_v51 = vsub.f32 %v172_v56, %v257_v8  ;;  %v158_v8 = vld [vmem:[%s2402_s1 + $0x60] sm:$0xff] }
  0x2f   : > { %1460 = vmatprep.subr.bf16.mxu1 %v1459_v19  ;;  %v463_v52 = vsub.f32 %v1893_v63, %v2405_v11  ;;  %v470_v59 = vsub.f32 %v1914_v12, %v2404_v23  ;;  %v212_v2 = vand.u32 4294901760, %v157_v18  ;;  %v1994_v3 = vsub.f32 %v173_v57, %v260_v13 }
  0x30   : > { %2456 = vst [vmem:[#allocation5_spill] sm:$0xff] %v1977_v48  ;;  %v1461_v56 = vpack.c.bf16 %v345_v47, %v338_v37  ;;  %1440 = vmatprep.subr.bf16.mxu0 %v1977_v48  ;;  %v2407_v6 = vand.u32 4294901760, %v1918_v17  ;;  %v2410_v7 = vand.u32 4294901760, %v1932_v42  ;;  %v2003_v0 = vsub.f32 %v156_v1, %v209_v24 }
  0x31   : > { %v464_v19 = vand.u32 4294901760, %v463_v52  ;;  %v471_v23 = vand.u32 4294901760, %v470_v59  ;;  %v2001_v11 = vpack.c.bf16 %v212_v2, %v209_v24  ;;  %v263_v37 = vand.u32 4294901760, %v174_v29  ;;  %v159_v52 = vld [vmem:[%s2402_s1 + $0x68] sm:$0xff] }
  0x32   : > { %1462 = vmatpush3.bf16.msra.mxu1 %v1461_v56  ;;  %v351_v57 = vsub.f32 %v1918_v17, %v2407_v6  ;;  %v358_v13 = vsub.f32 %v1932_v42, %v2410_v7  ;;  %v266_v47 = vand.u32 4294901760, %v175_v55  ;;  %v2414_v24 = vand.u32 4294901760, %v1936_v50 }
  0x33   : > { %2457 = vst [vmem:[#allocation6_spill] sm:$0xff] %v2001_v11  ;;  %v1463_v1 = vpack.c.bf16 %v471_v23, %v464_v19  ;;  %1442 = vmatpush3.bf16.msra.mxu0 %v2001_v11  ;;  %v2413_v59 = vand.u32 4294901760, %v1951_v60  ;;  %v215_v56 = vand.u32 4294901760, %v158_v8  ;;  %v2022_v6 = vsub.f32 %v157_v18, %v212_v2  ;;  %v176_v18 = vld [vmem:[%s2402_s1 + $0xf0] sm:$0xff]  ;;  %v177_v2 = vld [vmem:[%s2402_s1 + $0xf8] sm:$0xff] }
  0x34   : > { %v352_v61 = vand.u32 4294901760, %v351_v57  ;;  %v359_v34 = vand.u32 4294901760, %v358_v13  ;;  %v2024_v7 = vpack.c.bf16 %v266_v47, %v263_v37  ;;  %v2026_v33 = vsub.f32 %v174_v29, %v263_v37  ;;  %v145_v11 = vld [vmem:[%s2065_s4 + $0x18] sm:$0xff] }
  0x35   : > { %1464 = vmatprep.subr.bf16.mxu1 %v1463_v1  ;;  %v477_v23 = vsub.f32 %v1936_v50, %v2414_v24  ;;  %v484_v19 = vsub.f32 %v1951_v60, %v2413_v59  ;;  %v218_v10 = vand.u32 4294901760, %v159_v52  ;;  %v2042_v57 = vsub.f32 %v175_v55, %v266_v47  ;;  %v160_v1 = vld [vmem:[%s2402_s1 + $0x70] sm:$0xff] }
  0x36   : > { %2458 = vst [vmem:[#allocation7_spill] sm:$0xff] %v2024_v7  ;;  %v1465_v29 = vpack.c.bf16 %v359_v34, %v352_v61  ;;  %1444 = vmatprep.subr.bf16.mxu0 %v2024_v7  ;;  %v2418_v13 = vand.u32 4294901760, %v1960_v5  ;;  %v2417_v37 = vand.u32 4294901760, %v1975_v30  ;;  %v2051_v54 = vsub.f32 %v158_v8, %v215_v56 }
  0x37   : > { %v478_v59 = vand.u32 4294901760, %v477_v23  ;;  %v485_v24 = vand.u32 4294901760, %v484_v19  ;;  %v2049_v9 = vpack.c.bf16 %v218_v10, %v215_v56  ;;  %v269_v55 = vand.u32 4294901760, %v176_v18  ;;  %v161_v23 = vld [vmem:[%s2402_s1 + $0x78] sm:$0xff] }
  0x38   : > { %1466 = vmatpush3.bf16.msra.mxu1 %v1465_v29  ;;  %v365_v34 = vsub.f32 %v1960_v5, %v2418_v13  ;;  %v372_v61 = vsub.f32 %v1975_v30, %v2417_v37  ;;  %v272_v47 = vand.u32 4294901760, %v177_v2  ;;  %v2426_v56 = vand.u32 4294901760, %v1979_v51 }
  0x39   : > { %2459 = vst [vmem:[#allocation8_spill] sm:$0xff] %v2049_v9  ;;  %v1467_v8 = vpack.c.bf16 %v485_v24, %v478_v59  ;;  %1446 = vmatpush3.bf16.msra.mxu0 %v2049_v9  ;;  %v2427_v19 = vand.u32 4294901760, %v1994_v3  ;;  %v221_v29 = vand.u32 4294901760, %v160_v1  ;;  %v2070_v37 = vsub.f32 %v159_v52, %v218_v10 }
  0x3a   : > { %v366_v13 = vand.u32 4294901760, %v365_v34  ;;  %v373_v53 = vand.u32 4294901760, %v372_v61  ;;  %v2072_v36 = vpack.c.bf16 %v272_v47, %v269_v55  ;;  %v2074_v35 = vsub.f32 %v176_v18, %v269_v55  ;;  %v142_v34 = vld [vmem:[%s2065_s4] sm:$0xff] }
  0x3b   : > { %1468 = vmatprep.subr.bf16.mxu1 %v1467_v8  ;;  %v491_v24 = vsub.f32 %v1979_v51, %v2426_v56  ;;  %v498_v59 = vsub.f32 %v1994_v3, %v2427_v19  ;;  %v224_v44 = vand.u32 4294901760, %v161_v23  ;;  %v2084_v10 = vsub.f32 %v177_v2, %v272_v47 }
  0x3c   : > { %2460 = vst [vmem:[#allocation9_spill] sm:$0xff] %v2072_v36  ;;  %v1469_v9 = vpack.c.bf16 %v373_v53, %v366_v13  ;;  %1448 = vmatprep.subr.bf16.mxu0 %v2072_v36  ;;  %v2428_v52 = vand.u32 4294901760, %v2003_v0  ;;  %v2429_v18 = vand.u32 4294901760, %v2022_v6  ;;  %v2091_v56 = vsub.f32 %v160_v1, %v221_v29 }
  0x3d   : > { %v492_v61 = vand.u32 4294901760, %v491_v24  ;;  %v499_v55 = vand.u32 4294901760, %v498_v59  ;;  %v2089_v8 = vpack.c.bf16 %v224_v44, %v221_v29  ;;  %v2099_v13 = vand.u32 4294901760, %v143_v41 }
  0x3e   : > { %1470 = vmatpush3.bf16.msra.mxu1 %v1469_v9  ;;  %v379_v53 = vsub.f32 %v2003_v0, %v2428_v52  ;;  %v386_v2 = vsub.f32 %v2022_v6, %v2429_v18  ;;  %v2432_v47 = vand.u32 4294901760, %v2026_v33  ;;  %v2438_v24 = vand.u32 4294901760, %v2042_v57 }
  0x3f   : > { %2461 = vst [vmem:[#allocation10_spill] sm:$0xff] %v2089_v8  ;;  %2462 = vst [vmem:[#allocation11_spill] sm:$0xff] %v2099_v13  ;;  %v1471_v19 = vpack.c.bf16 %v499_v55, %v492_v61  ;;  %1450 = vmatpush3.bf16.msra.mxu0 %v2089_v8  ;;  %v1483_v9 = vpack.c.bf16 %v1842_v32, %v1840_v31  ;;  %v2106_v1 = vand.u32 4294901760, %v142_v34  ;;  %530 = vmatprep.mubr.f32.mxu1 %v2099_v13 }
  0x40   : > { %v380_v29 = vand.u32 4294901760, %v379_v53  ;;  %v387_v59 = vand.u32 4294901760, %v386_v2  ;;  %v2109_v52 = vsub.f32 %v143_v41, %v2099_v13  ;;  %v505_v18 = vsub.f32 %v2026_v33, %v2432_v47 }
  0x41   : > { %1472 = vmatprep.subr.bf16.mxu1 %v1471_v19  ;;  %v512_v61 = vsub.f32 %v2042_v57, %v2438_v24  ;;  %1484 = vmatprep.subr.bf16.mxu0 %v1483_v9  ;;  %v2119_v55 = vsub.f32 %v142_v34, %v2106_v1  ;;  %v2437_v53 = vand.u32 4294901760, %v2051_v54  ;;  %v2439_v41 = vand.u32 4294901760, %v2070_v37 }
  0x42   : > { %v2123_v2 = vsub.f32 %v161_v23, %v224_v44  ;;  %v1473_v8 = vpack.c.bf16 %v387_v59, %v380_v29  ;;  %v2440_v47 = vand.u32 4294901760, %v2109_v52  ;;  %v506_v36 = vand.u32 4294901760, %v505_v18 }
  0x43   : > { %2463 = vst [vmem:[#allocation12_spill] sm:$0xff] %v2119_v55  ;;  %v513_v13 = vand.u32 4294901760, %v512_v61  ;;  %v2445_v19 = vand.u32 4294901760, %v2119_v55  ;;  %v393_v9 = vsub.f32 %v2051_v54, %v2437_v53  ;;  %v400_v34 = vsub.f32 %v2070_v37, %v2439_v41 }
  0x44   : > { %1474 = vmatpush3.bf16.msra.mxu1 %v1473_v8  ;;  %v277_v44 = vsub.f32 %v2109_v52, %v2440_v47  ;;  %v1485_v23 = vpack.c.bf16 %v1820_v21, %v1810_v15  ;;  %v2446_v18 = vand.u32 4294901760, %v2074_v35  ;;  %v2447_v29 = vand.u32 4294901760, %v2084_v10 }
  0x45   : > { %v1475_v59 = vpack.c.bf16 %v513_v13, %v506_v36  ;;  %v283_v61 = vsub.f32 %v2119_v55, %v2445_v19  ;;  %v394_v53 = vand.u32 4294901760, %v393_v9  ;;  %v401_v24 = vand.u32 4294901760, %v400_v34 }
  0x46   : > { %v278_v41 = vand.u32 4294901760, %v277_v44  ;;  %v519_v8 = vsub.f32 %v2074_v35, %v2446_v18  ;;  %v526_v47 = vsub.f32 %v2084_v10, %v2447_v29  ;;  %v2449_v7 = vand.u32 4294901760, %v2091_v56 }
  0x47   : > { %1476 = vmatprep.subr.bf16.mxu1 %v1475_v59  ;;  %v284_v36 = vand.u32 4294901760, %v283_v61  ;;  %v1477_v13 = vpack.c.bf16 %v401_v24, %v394_v53  ;;  %v1487_v9 = vpack.c.bf16 %v1833_v26, %v1831_v25  ;;  %v2448_v34 = vand.u32 4294901760, %v2123_v2  ;;  %v144_v24 = vld [vmem:[%s2065_s4 + $0x10] sm:$0xff] }
  0x48   : > { %279 = vmatprep.mubr.f32.mxu0 %v278_v41  ;;  %v520_v44 = vand.u32 4294901760, %v519_v8  ;;  %v527_v19 = vand.u32 4294901760, %v526_v47  ;;  %v407_v18 = vsub.f32 %v2091_v56, %v2449_v7  ;;  %v2160_v61 = vand.u32 4294901760, %v145_v11 }
  0x49   : > { %285 = vmatmul.mubr.f32.vlgmr.msra.gmra.mrb[0].mxu0 %v284_v36  ;;  %1478 = vmatpush3.bf16.msra.mxu1 %v1477_v13  ;;  %v414_v59 = vsub.f32 %v2123_v2, %v2448_v34  ;;  %v1489_v41 = vpack.c.bf16 %v1850_v38, %v1837_v28  ;;  %v1491_v8 = vpack.c.bf16 %v1860_v43, %v1854_v40  ;;  %v2170_v13 = vand.u32 4294901760, %v144_v24 }
  0x4a   : > { %1486 = vmatpush3.bf16.msra.mxu0 %v1485_v23  ;;  %v1479_v53 = vpack.c.bf16 %v527_v19, %v520_v44  ;;  %v408_v29 = vand.u32 4294901760, %v407_v18  ;;  %v2168_v36 = vsub.f32 %v145_v11, %v2160_v61  ;;  %v1493_v23 = vpack.c.bf16 %v1889_v58, %v1865_v46 }
  0x4b   : > { %1488 = vmatprep.subr.bf16.mxu0 %v1487_v9  ;;  %v415_v47 = vand.u32 4294901760, %v414_v59  ;;  %v1495_v19 = vpack.c.bf16 %v1914_v12, %v1893_v63  ;;  %v2464_v18 = vand.u32 4294901760, %v1840_v31  ;;  %v2465_v9 = vand.u32 4294901760, %v1842_v32 }
  0x4c   : > { %1480 = vmatprep.subr.bf16.mxu1 %v1479_v53  ;;  %v291_v59 = vand.u32 4294901760, %v2168_v36  ;;  %v2182_v11 = vsub.f32 %v144_v24, %v2170_v13  ;;  %v2466_v53 = vand.u32 4294901760, %v1810_v15  ;;  %v2468_v7 = vand.u32 4294901760, %v1831_v25 }
  0x4d   : > { %v1481_v34 = vpack.c.bf16 %v415_v47, %v408_v29  ;;  %v1547_v44 = vpack.c.bf16 %v2465_v9, %v2464_v18  ;;  %v2467_v29 = vand.u32 4294901760, %v1820_v21  ;;  %v2469_v55 = vand.u32 4294901760, %v1833_v26 }
  0x4e   : > { %1490 = vmatpush3.bf16.msra.mxu0 %v1489_v41  ;;  %v2470_v31 = vand.u32 4294901760, %v1837_v28  ;;  %v2471_v32 = vand.u32 4294901760, %v1850_v38  ;;  %v2472_v24 = vand.u32 4294901760, %v1854_v40  ;;  %v2473_v18 = vand.u32 4294901760, %v1860_v43 }
  0x4f   : > { %v1549_v47 = vpack.c.bf16 %v2467_v29, %v2466_v53  ;;  %v1551_v48 = vpack.c.bf16 %v2469_v55, %v2468_v7  ;;  %1482 = vmatpush3.bf16.msra.mxu1 %v1481_v34  ;;  %1492 = vmatprep.subr.bf16.mxu0 %v1491_v8  ;;  %v2474_v21 = vand.u32 4294901760, %v1865_v46  ;;  %v2475_v9 = vand.u32 4294901760, %v1889_v58 }
  0x50   : > { %v1553_v41 = vpack.c.bf16 %v2471_v32, %v2470_v31  ;;  %v1555_v15 = vpack.c.bf16 %v2473_v18, %v2472_v24  ;;  %1516 = vmatprep.subr.bf16.mxu1 %v1808_v14  ;;  %v292_v26 = vsub.f32 %v2168_v36, %v291_v59  ;;  %v297_v28 = vand.u32 4294901760, %v2182_v11 }
  0x51   : > { %v2204_v25 = vpack.c.bf16 %v2475_v9, %v2474_v21  ;;  %v2476_v38 = vand.u32 4294901760, %v1893_v63  ;;  %v2477_v40 = vand.u32 4294901760, %v1914_v12  ;;  %v2478_v7 = vand.u32 4294901760, %v1918_v17  ;;  %v2486_v21 = vld [vmem:[#allocation6_spill] sm:$0xff]  ;;  %v2487_v9 = vld [vmem:[#allocation7_spill] sm:$0xff] }
  0x52   : > { %v2479_v46 = vand.u32 4294901760, %v1932_v42  ;;  %v2480_v55 = vand.u32 4294901760, %v1936_v50  ;;  %v2481_v34 = vand.u32 4294901760, %v1951_v60  ;;  %v2482_v53 = vand.u32 4294901760, %v1960_v5  ;;  %532 = vmatmul.mubr.f32.vlgmr.msra.gmra.mrb[0].mxu1 %v2106_v1  ;;  %1494 = vmatpush3.bf16.msra.mxu0 %v1493_v23 }
  0x53   : > { %v1559_v43 = vpack.c.bf16 %v2477_v40, %v2476_v38  ;;  %v2483_v29 = vand.u32 4294901760, %v1975_v30  ;;  %v1497_v12 = vpack.c.bf16 %v1932_v42, %v1918_v17  ;;  %v293_v31 = vand.u32 4294901760, %v292_v26  ;;  %1518 = vmatpush3.bf16.msra.mxu1 %v1818_v20  ;;  %1496 = vmatprep.subr.bf16.mxu0 %v1495_v19  ;;  %v2485_v19 = vld [vmem:[#allocation5_spill] sm:$0xff]  ;;  %v2488_v26 = vld [vmem:[#allocation12_spill] sm:$0xff] }
  0x54   : > { %v2219_v58 = vpack.c.bf16 %v2479_v46, %v2478_v7  ;;  %v2225_v8 = vpack.c.bf16 %v2481_v34, %v2480_v55  ;;  %v298_v32 = vsub.f32 %v2182_v11, %v297_v28  ;;  %v1499_v24 = vpack.c.bf16 %v1951_v60, %v1936_v50  ;;  %1520 = vmatprep.subr.bf16.mxu1 %v1822_v22  ;;  %v2489_v38 = vld [vmem:[#allocation8_spill] sm:$0xff]  ;;  %v2490_v40 = vld [vmem:[#allocation9_spill] sm:$0xff]  ;;  %v2491_v7 = vld [vmem:[#allocation11_spill] sm:$0xff] }
  0x55   : > { %v2231_v63 = vpack.c.bf16 %v2483_v29, %v2482_v53  ;;  %294 = vmatprep.mubr.f32.mxu0 %v293_v31  ;;  %537 = vmatprep.mubr.f32.mxu1 %v2160_v61  ;;  %v1501_v17 = vpack.c.bf16 %v1975_v30, %v1960_v5  ;;  %v1503_v42 = vpack.c.bf16 %v1994_v3, %v1979_v51  ;;  %v2484_v50 = vand.u32 4294901760, %v2109_v52  ;;  %v2492_v46 = vld [vmem:[#allocation10_spill] sm:$0xff] }
  0x56   : > { %v299_v18 = vand.u32 4294901760, %v298_v32  ;;  %1498 = vmatpush3.bf16.msra.mxu0 %v1497_v12  ;;  %539 = vmatmul.mubr.f32.gmra.mrb[2].mxu1 %v2170_v13  ;;  %v1505_v60 = vpack.c.bf16 %v2022_v6, %v2003_v0  ;;  %v1507_v5 = vpack.c.bf16 %v2042_v57, %v2026_v33  ;;  %v1509_v30 = vpack.c.bf16 %v2070_v37, %v2051_v54 }
  0x57   : > { %1522 = vmatpush3.bf16.msra.mxu1 %v1835_v27  ;;  %1500 = vmatprep.subr.bf16.mxu0 %v1499_v24  ;;  %v1513_v23 = vpack.c.bf16 %v2123_v2, %v2091_v56 }
  0x58   : > { %1524 = vmatprep.subr.bf16.mxu1 %v1852_v39  ;;  %300 = vmatmul.mubr.f32.gmra.mrb[2].mxu0 %v299_v18 }
  0x59   : > { %674 = vmatprep.mubr.f32.mxu0 %v2109_v52  ;;  %790 = vmatprep.mubr.f32.mxu1 %v2484_v50  ;;  %v1511_v52 = vpack.c.bf16 %v2084_v10, %v2074_v35 }
  0x5a   : > { %1502 = vmatpush3.bf16.msra.mxu0 %v1501_v17 }
  0x5b   : > { %1526 = vmatpush3.bf16.msra.mxu1 %v1863_v45  ;;  %1504 = vmatprep.subr.bf16.mxu0 %v1503_v42 }
  0x5c   : > { %1528 = vmatprep.subr.bf16.mxu1 %v1891_v62 }
  0x5e   : > { %1506 = vmatpush3.bf16.msra.mxu0 %v1505_v60 }
  0x5f   : > { %1530 = vmatpush3.bf16.msra.mxu1 %v1916_v16  ;;  %1508 = vmatprep.subr.bf16.mxu0 %v1507_v5 }
  0x60   : > { %1532 = vmatprep.subr.bf16.mxu1 %v1934_v49 }
  0x62   : > { %1510 = vmatpush3.bf16.msra.mxu0 %v1509_v30 }
  0x63   : > { %1534 = vmatpush3.bf16.msra.mxu1 %v1958_v4  ;;  %1512 = vmatprep.subr.bf16.mxu0 %v1511_v52 }
  0x64   : > { %1536 = vmatprep.subr.bf16.mxu1 %v2485_v19 }
  0x66   : > { %1514 = vmatpush3.bf16.msra.mxu0 %v1513_v23 }
  0x67   : > { %1538 = vmatpush3.bf16.msra.mxu1 %v2486_v21  ;;  %1548 = vmatprep.subr.bf16.mxu0 %v1547_v44  ;;  %v2493_v44 = vand.u32 4294901760, %v2488_v26 }
  0x68   : > { %1540 = vmatprep.subr.bf16.mxu1 %v2487_v9 }
  0x69   : > { %677 = vmatmul.mubr.f32.vlgmr.msra.gmra.mrb[4].mxu0 %v2488_v26 }
  0x6a   : > { %1550 = vmatpush3.bf16.msra.mxu0 %v1549_v47  ;;  %683 = vmatprep.mubr.f32.mxu0 %v2168_v36  ;;  %v2497_v36 = vand.u32 4294901760, %v2022_v6 }
  0x6b   : > { %1542 = vmatpush3.bf16.msra.mxu1 %v2489_v38  ;;  %1552 = vmatprep.subr.bf16.mxu0 %v1551_v48  ;;  %v2495_v48 = vand.u32 4294901760, %v1994_v3 }
  0x6c   : > { %1544 = vmatprep.subr.bf16.mxu1 %v2490_v40 }
  0x6d   : > { %686 = vmatmul.mubr.f32.gmra.mrb[6].mxu0 %v2182_v11  ;;  %v2501_v11 = vand.u32 4294901760, %v2070_v37 }
  0x6e   : > { %1554 = vmatpush3.bf16.msra.mxu0 %v1553_v41  ;;  %971 = vmatprep.mubr.f32.mxu0 %v2491_v7 }
  0x6f   : > { %1546 = vmatpush3.bf16.msra.mxu1 %v2492_v46  ;;  %1556 = vmatprep.subr.bf16.mxu0 %v1555_v15 }
  0x70   : > { %1580 = vmatprep.subr.bf16.mxu1 %v1808_v14  ;;  %v2494_v14 = vand.u32 4294901760, %v1979_v51  ;;  %v2499_v51 = vand.u32 4294901760, %v2042_v57 }
  0x72   : > { %794 = vmatmul.mubr.f32.vlgmr.msra.gmra.mrb[4].mxu1 %v2493_v44  ;;  %1558 = vmatpush3.bf16.msra.mxu0 %v2204_v25 }
  0x73   : > { %1582 = vmatpush3.bf16.msra.mxu1 %v1818_v20  ;;  %801 = vmatprep.mubr.f32.mxu1 %v291_v59  ;;  %v1567_v20 = vpack.c.bf16 %v2495_v48, %v2494_v14 }
  0x74   : > { %1560 = vmatprep.subr.bf16.mxu0 %v1559_v43  ;;  %1584 = vmatprep.subr.bf16.mxu1 %v1822_v22  ;;  %v2496_v22 = vand.u32 4294901760, %v2003_v0  ;;  %v2502_v0 = vand.u32 4294901760, %v2074_v35  ;;  %v1717_v35 = vmov 0.0  }
  0x75   : > { %1097 = vst.msk [vmem:[%s2339_s7] sm:$0xff] %vm1096_vm0, %v1717_v35  ;;  %1100 = vst.msk [vmem:[%s2339_s7 + $0x18] sm:$0xff] %vm1096_vm0, %v1717_v35 }
  0x76   : > { %805 = vmatmul.mubr.f32.gmra.mrb[6].mxu1 %v297_v28  ;;  %1562 = vmatpush3.bf16.msra.mxu0 %v2219_v58  ;;  %v1569_v59 = vpack.c.bf16 %v2497_v36, %v2496_v22 }
  0x77   : > { %1586 = vmatpush3.bf16.msra.mxu1 %v1835_v27  ;;  %1564 = vmatprep.subr.bf16.mxu0 %v2225_v8  ;;  %v2498_v27 = vand.u32 4294901760, %v2026_v33  ;;  %v2504_v33 = vand.u32 4294901760, %v2091_v56 }
  0x78   : > { %1588 = vmatprep.subr.bf16.mxu1 %v1852_v39  ;;  %1082 = vmatprep.mubr.f32.mxu1 %v2491_v7  ;;  %v2500_v39 = vand.u32 4294901760, %v2051_v54 }
  0x79   : > { %v1571_v3 = vpack.c.bf16 %v2499_v51, %v2498_v27 }
  0x7a   : > { %1566 = vmatpush3.bf16.msra.mxu0 %v2231_v63  ;;  %v1573_v47 = vpack.c.bf16 %v2501_v11, %v2500_v39 }
  0x7b   : > { %1590 = vmatpush3.bf16.msra.mxu1 %v1863_v45  ;;  %1568 = vmatprep.subr.bf16.mxu0 %v1567_v20  ;;  %v2503_v45 = vand.u32 4294901760, %v2084_v10 }
  0x7c   : > { %1592 = vmatprep.subr.bf16.mxu1 %v1891_v62  ;;  %v2505_v62 = vand.u32 4294901760, %v2123_v2 }
  0x7d   : > { %v1575_v6 = vpack.c.bf16 %v2503_v45, %v2502_v0 }
  0x7e   : > { %1570 = vmatpush3.bf16.msra.mxu0 %v1569_v59  ;;  %v1577_v57 = vpack.c.bf16 %v2505_v62, %v2504_v33 }
  0x7f   : > { %1594 = vmatpush3.bf16.msra.mxu1 %v1916_v16  ;;  %1572 = vmatprep.subr.bf16.mxu0 %v1571_v3 }
  0x80   : > { %1596 = vmatprep.subr.bf16.mxu1 %v1934_v49 }
  0x82   : > { %1574 = vmatpush3.bf16.msra.mxu0 %v1573_v47 }
  0x83   : > { %1598 = vmatpush3.bf16.msra.mxu1 %v1958_v4  ;;  %1576 = vmatprep.subr.bf16.mxu0 %v1575_v6 }
  0x84   : > { %1600 = vmatprep.subr.bf16.mxu1 %v2485_v19 }
  0x86   : > { %1578 = vmatpush3.bf16.msra.mxu0 %v1577_v57 }
  0x87   : > { %1602 = vmatpush3.bf16.msra.mxu1 %v2486_v21 }
  0x88   : > { %1604 = vmatprep.subr.bf16.mxu1 %v2487_v9 }
  0x89   : > { %973 = vmatmul.mubr.f32.vlgmr.msra.gmra.mrb[8].mxu0 %v2106_v1 }
  0x8a   : > { %978 = vmatprep.mubr.f32.mxu0 %v2160_v61 }
  0x8b   : > { %1606 = vmatpush3.bf16.msra.mxu1 %v2489_v38 }
  0x8c   : > { %1608 = vmatprep.subr.bf16.mxu1 %v2490_v40 }
  0x8d   : > { %980 = vmatmul.mubr.f32.gmra.mrb[10].mxu0 %v2170_v13 }
  0x8f   : > { %1610 = vmatpush3.bf16.msra.mxu1 %v2492_v46 }
  0x92   : > { %1084 = vmatmul.mubr.f32.vlgmr.msra.gmra.mrb[8].mxu1 %v2106_v1 }
  0x93   : > { %1089 = vmatprep.mubr.f32.mxu1 %v2160_v61 }
  0x96   : > { %1091 = vmatmul.mubr.f32.gmra.mrb[10].mxu1 %v2170_v13 }
 0x11c   : > { %v1223_v54 = vpop.f32.mrb[0].mxu0 }
 0x11d   : > { %v1224_v16 = vpop.f32.mrb[1].mxu0 }
 0x11e   : > { %v1225_v49 = vadd.f32 %v1224_v16, %v1223_v54 }
 0x125   : > { %v1261_v4 = vpop.f32.mrb[0].mxu1 }
 0x126   : > { %v1262_v37 = vpop.f32.mrb[1].mxu1 }
 0x127   : > { %v1263_v56 = vadd.f32 %v1262_v37, %v1261_v4 }
 0x129   : > { %v534_v10 = vadd.f32 %v1263_v56, %v1225_v49  ;;  %v1264_v1 = vpop.f32.mrb[2].mxu1 }
 0x12a   : > { %v1265_v2 = vpop.f32.mrb[3].mxu1 }
 0x12b   : > { %v1226_v61 = vpop.f32.mrb[2].mxu0  ;;  %v1266_v13 = vadd.f32 %v1265_v2, %v1264_v1 }
 0x12c   : > { %v1227_v41 = vpop.f32.mrb[3].mxu0 }
 0x12d   : > { %v1228_v15 = vadd.f32 %v1227_v41, %v1226_v61 }
 0x12f   : > { %v541_v25 = vadd.f32 %v1266_v13, %v1228_v15 }
 0x13c   : > { %v1299_v28 = vpop.f32.mrb[4].mxu0 }
 0x13d   : > { %v1300_v43 = vpop.f32.mrb[5].mxu0 }
 0x13e   : > { %v1301_v58 = vadd.f32 %v1300_v43, %v1299_v28 }
 0x140   : > { %v679_v55 = vadd.f32 %v1301_v58, %v534_v10  ;;  %v1302_v34 = vpop.f32.mrb[6].mxu0 }
 0x141   : > { %v1303_v8 = vpop.f32.mrb[7].mxu0 }
 0x142   : > { %v1304_v53 = vadd.f32 %v1303_v8, %v1302_v34 }
 0x144   : > { %v688_v29 = vadd.f32 %v1304_v53, %v541_v25 }
 0x145   : > { %v1337_v63 = vpop.f32.mrb[4].mxu1 }
 0x146   : > { %v1338_v12 = vpop.f32.mrb[5].mxu1 }
 0x147   : > { %v1339_v31 = vadd.f32 %v1338_v12, %v1337_v63 }
 0x149   : > { %v796_v32 = vadd.f32 %v1339_v31, %v679_v55  ;;  %v1340_v24 = vpop.f32.mrb[6].mxu1 }
 0x14a   : > { %v1341_v18 = vpop.f32.mrb[7].mxu1 }
 0x14b   : > { %v1342_v17 = vadd.f32 %v1341_v18, %v1340_v24 }
 0x14d   : > { %v807_v42 = vadd.f32 %v1342_v17, %v688_v29 }
 0x15c   : > { %v1375_v50 = vpop.f32.mrb[8].mxu0 }
 0x15d   : > { %v1376_v60 = vpop.f32.mrb[9].mxu0 }
 0x15e   : > { %v1377_v5 = vadd.f32 %v1376_v60, %v1375_v50 }
 0x160   : > { %v975_v30 = vadd.f32 %v1377_v5, %v796_v32  ;;  %v1378_v52 = vpop.f32.mrb[10].mxu0 }
 0x161   : > { %v1379_v23 = vpop.f32.mrb[11].mxu0 }
 0x162   : > { %v1380_v19 = vadd.f32 %v1379_v23, %v1378_v52 }
 0x164   : > { %v982_v21 = vadd.f32 %v1380_v19, %v807_v42 }
 0x165   : > { %v1413_v9 = vpop.f32.mrb[8].mxu1 }
 0x166   : > { %v1414_v26 = vpop.f32.mrb[9].mxu1 }
 0x167   : > { %v1415_v38 = vadd.f32 %v1414_v26, %v1413_v9 }
 0x169   : > { %v1086_v40 = vadd.f32 %v1415_v38, %v975_v30  ;;  %v1416_v7 = vpop.f32.mrb[10].mxu1 }
 0x16a   : > { %v1417_v46 = vpop.f32.mrb[11].mxu1 }
 0x16b   : > { %1098 = vst.msk [vmem:[%s2339_s7 + $0x8] sm:$0xff] %vm1096_vm0, %v1086_v40  ;;  %v1418_v44 = vadd.f32 %v1417_v46, %v1416_v7 }
 0x16d   : > { %v1093_v14 = vadd.f32 %v1418_v44, %v982_v21 }
 0x16f   : > { %1099 = vst.msk [vmem:[%s2339_s7 + $0x10] sm:$0xff] %vm1096_vm0, %v1093_v14 }
 0x170   : > { %1666 = shalt.err (!%p1663_p3)
}
 0x171   : > { %s1667_s26 = scalar_lea.hbm %s2352_s21, 512  ;;  %s1671_s29 = scalar_lea.hbm %s2403_s2, 1024 }
 0x172   : > { %p1668_p4 = scmp.ne.s32.totalorder %s2352_s21, %s1667_s26  ;;  %p1672_p9 = scmp.lt.u32.totalorder %s2352_s21, %s2403_s2 }
 0x173   : > { %p1673_p10 = scmp.lt.u32.totalorder %s1671_s29, %s1667_s26  ;;  %p1675_p12 = scmp.lt.u32.totalorder %s1667_s26, %s2352_s21 }
 0x174   : > { %p1669_p7 = pnand %p1668_p4, %p1774_p5 }
 0x175   : > { %p1674_p11 = por %p1673_p10, %p1672_p9 }
 0x176   : > { %p1670_p8 = pneg %p1669_p7 }
 0x177   : > { %p1676_p13 = por %p1675_p12, %p1674_p11 }
 0x179   : > { %p1677_p0 = pnand %p1676_p13, %p1670_p8 }
 0x17b   : > { %1680 = shalt.err (!%p1677_p0)
}
 0x17c   : > { %s1719_s4 = smov 128   ;;  %s1720_s5 = smov 8  }
 0x17d   : > { %1611 = dma.vmem_to_hbm [thread:$0]  (%p1774_p5), %s2354_s8, 512, %s2352_s21, %s2360_s22, %s1719_s4, %s1719_s4, %s1720_s5  }
 0x17e PF: > { %p1617_p1 = scmp.ge.s32.totalorder %s1715_s12, 2  ;;  %s1130_s6 = sand.u32 1, %s1703_s9  }
 0x17f   : > { %s1131_s7 = scalar_lea.sflag [#allocation3], %s1130_s6 }
 0x180   : > { %p1614_p2 = pnand %p1617_p1, %p1778_p6 }
 0x182   : > { %1698 = dma.done.wait (!%p1614_p2), %s1131_s7, 512  }
 0x183   : > { %1700 = vsyncadd (!%p1614_p2), %s1131_s7, 4294966784  ;;  %p12_p3 = scmp.ge.s32.totalorder %s1761_s15, 4   ;;  %s2506_s9 = smov %s1707_s10 }
 0x184   : > { %s2507_s10 = smov %s1711_s11  ;;  %s2508_s11 = smov %s1772_s18 }
 0x185   : > { %s2509_s12 = smov %s1761_s15  ;;  %14 = sbr.rel (!%p12_p3) target bundleno = 3 (0x3), region = 63 }
 0x18c   :  { %1136 = vsyncpa [#allocation3], 1 }
 0x18d   :  { %1138 = vsyncpa [#allocation3 + $0x1], 1 }

</bundles_post_ra>
